<compile_context>
chip_gen: v5e
topology: v5e:2x2
jax: 0.10.0
libtpu: 0.0.40
codegen_flags: <defaults>
</compile_context>

<pallas_src>
import jax
import jax.numpy as jnp
from jax.experimental import pallas as pl
from jax.experimental.pallas import tpu as pltpu


def qnetwork_kernel(x_ref, w1_ref, b1_ref, w2_ref, b2_ref, out_ref):
    # Fused MLP on one batch tile: relu(x @ W1 + b1) @ W2 + b2.
    x = x_ref[...].astype(w1_ref.dtype)                     # [TB, S]  f32 -> bf16 in-kernel
    h = jnp.dot(x, w1_ref[...],
                preferred_element_type=jnp.float32)          # [TB, Hp] f32
    h = jnp.maximum(h + b1_ref[...], 0.0)                    # bias + ReLU in f32
    h = h.astype(w2_ref.dtype)                               # bf16 for the MXU
    o = jnp.dot(h, w2_ref[...],
                preferred_element_type=jnp.float32)          # [TB, A]  f32
    out_ref[...] = (o + b2_ref[...]).astype(out_ref.dtype)


def _choose_batch_tile(B, tb_max):
    """Batch tile: 16-row aligned (bf16 row packing), <= tb_max, and an even
    tile count when possible so the 'parallel' axis uses both TCs on v7x."""
    SUB = 16
    if B <= tb_max:
        # Split into two tiles when it divides cleanly (dual-TC), otherwise a
        # single full-extent tile (legal: block dim == full array dim).
        if B >= 2 * SUB and B % (2 * SUB) == 0:
            return B // 2
        return B
    n_tiles = pl.cdiv(B, tb_max)
    if n_tiles % 2:
        n_tiles += 1
    tb = pl.cdiv(B, n_tiles)
    return pl.cdiv(tb, SUB) * SUB


def qnetwork_forward(state, w1, b1, w2, b2, *, tb_max=4096,
                     compute_dtype=jnp.bfloat16):
    """state: [B, state_size] f32. w1: [S, H], b1: [H], w2: [H, A], b2: [A].

    Returns [B, action_size] f32 (== relu(state @ w1 + b1) @ w2 + b2).
    """
    B, S = state.shape
    H = w1.shape[1]
    A = w2.shape[1]
    LANE = 128

    # Lane-dense hidden: zero-pad H to a multiple of 128. Zero W1 columns /
    # b1 entries give zero activations; zero W2 rows contribute nothing.
    H_pad = max(LANE, pl.cdiv(H, LANE) * LANE)

    # Weights/biases are tiny: one-time cast/pad, then VMEM-resident across
    # every batch tile via constant index_maps.
    w1c = jnp.pad(w1, ((0, 0), (0, H_pad - H))).astype(compute_dtype)      # [S, Hp]
    b1c = jnp.pad(b1, (0, H_pad - H)).reshape(1, H_pad).astype(jnp.float32)
    w2c = jnp.pad(w2, ((0, H_pad - H), (0, 0))).astype(compute_dtype)      # [Hp, A]
    b2c = b2.reshape(1, A).astype(jnp.float32)

    TB = _choose_batch_tile(B, tb_max)
    grid = pl.cdiv(B, TB)

    flops = 2 * B * (S * H_pad + H_pad * A)
    bytes_accessed = (state.size * state.dtype.itemsize
                      + w1c.size * w1c.dtype.itemsize
                      + w2c.size * w2c.dtype.itemsize
                      + (b1c.size + b2c.size) * 4
                      + B * A * 4)

    out = pl.pallas_call(
        qnetwork_kernel,
        out_shape=jax.ShapeDtypeStruct((B, A), jnp.float32),
        grid_spec=pltpu.PrefetchScalarGridSpec(
            num_scalar_prefetch=0,
            grid=(grid,),
            in_specs=[
                # Batch tile of raw f32 state, double-buffered across steps.
                pl.BlockSpec((TB, S), lambda i: (i, 0)),
                # Weights / biases: constant block index -> DMA'd once.
                pl.BlockSpec((S, H_pad), lambda i: (0, 0)),
                pl.BlockSpec((1, H_pad), lambda i: (0, 0)),
                pl.BlockSpec((H_pad, A), lambda i: (0, 0)),
                pl.BlockSpec((1, A), lambda i: (0, 0)),
            ],
            out_specs=pl.BlockSpec((TB, A), lambda i: (i, 0)),
        ),
        compiler_params=pltpu.CompilerParams(
            dimension_semantics=("parallel",)),
        cost_estimate=pl.CostEstimate(
            flops=flops, transcendentals=0, bytes_accessed=bytes_accessed),
    )(state, w1c, b1c, w2c, b2c)

    return out


def init_params(key, state_size, hidden, action_size):
    # PyTorch-style init: U(-1/sqrt(fan_in), 1/sqrt(fan_in)).
    k1, k2, k3, k4 = jax.random.split(key, 4)
    bound1 = 1.0 / jnp.sqrt(state_size)
    bound2 = 1.0 / jnp.sqrt(hidden)
    w1 = jax.random.uniform(k1, (state_size, hidden), jnp.float32, -bound1, bound1)
    b1 = jax.random.uniform(k2, (hidden,), jnp.float32, -bound1, bound1)
    w2 = jax.random.uniform(k3, (hidden, action_size), jnp.float32, -bound2, bound2)
    b2 = jax.random.uniform(k4, (action_size,), jnp.float32, -bound2, bound2)
    return w1, b1, w2, b2


def _reference(state, w1, b1, w2, b2, compute_dtype=jnp.bfloat16):
    # Reference with the same quantization the kernel uses (bf16 operands,
    # f32 accumulation) so tolerances stay tight.
    xq = state.astype(compute_dtype).astype(jnp.float32)
    w1q = w1.astype(compute_dtype).astype(jnp.float32)
    w2q = w2.astype(compute_dtype).astype(jnp.float32)
    h = jnp.maximum(xq @ w1q + b1, 0.0)
    return h.astype(compute_dtype).astype(jnp.float32) @ w2q + b2


if __name__ == "__main__":
    state_size = 16
    action_size = 4
    hidden = 64

    key = jax.random.PRNGKey(0)
    kx, kp, kb = jax.random.split(key, 3)
    w1, b1, w2, b2 = init_params(kp, state_size, hidden, action_size)

    # Small batch: single full-extent batch tile.
    batch = 2
    state_small = jax.random.normal(kx, (batch, state_size), jnp.float32)
    out_small = jax.block_until_ready(
        qnetwork_forward(state_small, w1, b1, w2, b2))
    ref_small = _reference(state_small, w1, b1, w2, b2)
    assert out_small.shape == (batch, action_size)
    assert jnp.allclose(out_small, ref_small, atol=1e-3, rtol=1e-3)

    # Larger batch: two 128-row tiles -> exercises the parallel tiled grid.
    big_batch = 256
    state_big = jax.random.normal(kb, (big_batch, state_size), jnp.float32)
    out_big = jax.block_until_ready(
        qnetwork_forward(state_big, w1, b1, w2, b2))
    ref_big = _reference(state_big, w1, b1, w2, b2)
    assert out_big.shape == (big_batch, action_size)
    assert jnp.allclose(out_big, ref_big, atol=1e-3, rtol=1e-3)

    print("KERNEL_OK")
</pallas_src>

<mosaic_0001>
module attributes {stable_mosaic.version = 11 : i64} {
  func.func @qnetwork_kernel(%arg0: i32, %arg1: memref<2x16xf32, #tpu.memory_space<vmem>>, %arg2: memref<16x128xbf16, #tpu.memory_space<vmem>>, %arg3: memref<1x128xf32, #tpu.memory_space<vmem>>, %arg4: memref<128x4xbf16, #tpu.memory_space<vmem>>, %arg5: memref<1x4xf32, #tpu.memory_space<vmem>>, %arg6: memref<2x4xf32, #tpu.memory_space<vmem>>) attributes {dimension_semantics = [#tpu.dimension_semantics<parallel>], iteration_bounds = array<i64: 1>, scalar_prefetch = 0 : i64, scratch_operands = 0 : i64, tpu.core_type = #tpu.core_type<tc>, window_params = [{transform_indices = @transform_0, window_bounds = array<i64: 2, 16>}, {pipeline_mode = #tpu.pipeline_mode<synchronous>, transform_indices = @transform_1, window_bounds = array<i64: 16, 128>}, {pipeline_mode = #tpu.pipeline_mode<synchronous>, transform_indices = @transform_2, window_bounds = array<i64: 1, 128>}, {pipeline_mode = #tpu.pipeline_mode<synchronous>, transform_indices = @transform_3, window_bounds = array<i64: 128, 4>}, {pipeline_mode = #tpu.pipeline_mode<synchronous>, transform_indices = @transform_4, window_bounds = array<i64: 1, 4>}, {transform_indices = @transform_5, window_bounds = array<i64: 2, 4>}]} {
    %c0 = arith.constant 0 : index
    %c0_0 = arith.constant 0 : index
    %0 = vector.load %arg1[%c0, %c0_0] : memref<2x16xf32, #tpu.memory_space<vmem>>, vector<2x16xf32>
    %1 = arith.truncf %0 : vector<2x16xf32> to vector<2x16xbf16>
    %c0_1 = arith.constant 0 : index
    %c0_2 = arith.constant 0 : index
    %2 = vector.load %arg2[%c0_1, %c0_2] : memref<16x128xbf16, #tpu.memory_space<vmem>>, vector<16x128xbf16>
    %cst = arith.constant dense<0.000000e+00> : vector<2x128xf32>
    %3 = tpu.matmul %1, %2, %cst {dimension_numbers = #tpu.dot_dimension_numbers<[1], [0], [0], [1], [0, 0, 1, 1], [], []>} : vector<2x16xbf16>, vector<16x128xbf16>, vector<2x128xf32> -> vector<2x128xf32>
    %c0_3 = arith.constant 0 : index
    %c0_4 = arith.constant 0 : index
    %4 = vector.load %arg3[%c0_3, %c0_4] : memref<1x128xf32, #tpu.memory_space<vmem>>, vector<1x128xf32>
    %5 = vector.broadcast %4 : vector<1x128xf32> to vector<2x128xf32>
    %6 = arith.addf %3, %5 : vector<2x128xf32>
    %cst_5 = arith.constant 0.000000e+00 : f32
    %7 = vector.broadcast %cst_5 : f32 to vector<2x128xf32>
    %8 = arith.maximumf %6, %7 : vector<2x128xf32>
    %9 = arith.truncf %8 : vector<2x128xf32> to vector<2x128xbf16>
    %c0_6 = arith.constant 0 : index
    %c0_7 = arith.constant 0 : index
    %10 = vector.load %arg4[%c0_6, %c0_7] : memref<128x4xbf16, #tpu.memory_space<vmem>>, vector<128x4xbf16>
    %cst_8 = arith.constant dense<0.000000e+00> : vector<2x4xf32>
    %11 = tpu.matmul %9, %10, %cst_8 {dimension_numbers = #tpu.dot_dimension_numbers<[1], [0], [0], [1], [0, 0, 1, 1], [], []>} : vector<2x128xbf16>, vector<128x4xbf16>, vector<2x4xf32> -> vector<2x4xf32>
    %c0_9 = arith.constant 0 : index
    %c0_10 = arith.constant 0 : index
    %12 = vector.load %arg5[%c0_9, %c0_10] : memref<1x4xf32, #tpu.memory_space<vmem>>, vector<1x4xf32>
    %13 = vector.broadcast %12 : vector<1x4xf32> to vector<2x4xf32>
    %14 = arith.addf %11, %13 : vector<2x4xf32>
    %c0_11 = arith.constant 0 : index
    %c0_12 = arith.constant 0 : index
    %15 = vector.load %arg6[%c0_11, %c0_12] : memref<2x4xf32, #tpu.memory_space<vmem>>, vector<2x4xf32>
    tpu.vector_store %arg6[%c0_11, %c0_12], %14 {strides = array<i32>} : memref<2x4xf32, #tpu.memory_space<vmem>>, vector<2x4xf32>,
    return
  }
  func.func @transform_0(%arg0: i32) -> (i32, i32) {
    %c0_i32 = arith.constant 0 : i32
    %c0_i32_0 = arith.constant 0 : i32
    return %arg0, %c0_i32 : i32, i32
  }
  func.func @transform_1(%arg0: i32) -> (i32, i32) {
    %c0_i32 = arith.constant 0 : i32
    %c0_i32_0 = arith.constant 0 : i32
    %c0_i32_1 = arith.constant 0 : i32
    return %c0_i32, %c0_i32_0 : i32, i32
  }
  func.func @transform_2(%arg0: i32) -> (i32, i32) {
    %c0_i32 = arith.constant 0 : i32
    %c0_i32_0 = arith.constant 0 : i32
    %c0_i32_1 = arith.constant 0 : i32
    return %c0_i32, %c0_i32_0 : i32, i32
  }
  func.func @transform_3(%arg0: i32) -> (i32, i32) {
    %c0_i32 = arith.constant 0 : i32
    %c0_i32_0 = arith.constant 0 : i32
    %c0_i32_1 = arith.constant 0 : i32
    return %c0_i32, %c0_i32_0 : i32, i32
  }
  func.func @transform_4(%arg0: i32) -> (i32, i32) {
    %c0_i32 = arith.constant 0 : i32
    %c0_i32_0 = arith.constant 0 : i32
    %c0_i32_1 = arith.constant 0 : i32
    return %c0_i32, %c0_i32_0 : i32, i32
  }
  func.func @transform_5(%arg0: i32) -> (i32, i32) {
    %c0_i32 = arith.constant 0 : i32
    %c0_i32_0 = arith.constant 0 : i32
    return %arg0, %c0_i32 : i32, i32
  }
}

</mosaic_0001>

<bundles_post_ra>
// kernel: tpu_custom_call.1
= control target key start
LH: loop header
LB: loop body
LE: loop exit
PB: predicated region body
PF: predicated region fallthrough
CT: control target
= control target key end

     0   :  { %vm36_vm0 = vcmask 130048   ;;  %s299_s0 = inlined_call_operand.vmem [shape: f32[2,16], index: 0, kind: input, shape index: {}]   ;;  %s300_s1 = inlined_call_operand.vmem [shape: bf16[16,128], index: 1, kind: input, shape index: {}]   ;;  %s301_s2 = inlined_call_operand.vmem [shape: f32[1,128], index: 2, kind: input, shape index: {}]   ;;  %s302_s3 = inlined_call_operand.vmem [shape: bf16[128,4], index: 3, kind: input, shape index: {}]   ;;  %s303_s4 = inlined_call_operand.vmem [shape: f32[1,4], index: 4, kind: input, shape index: {}]   ;;  %s304_s5 = inlined_call_operand.hbm [shape: f32[2,4], index: 5, kind: output, shape index: {}]  }
   0x1   :  { %v191_v0 = vld [vmem:[%s300_s1] sm:$0xff]  ;;  %v199_v2 = vld [vmem:[%s302_s3 + $0x38] sm:$0xff]  ;;  %v198_v4 = vld [vmem:[%s302_s3 + $0x30] sm:$0xff] }
   0x2   :  { %v22_v1 = vld [vmem:[%s299_s0] sm:$0x3]  ;;  %47 = vmatpush.bf16.msra.mxu0 %v191_v0  ;;  %123 = vmatpush.bf16.msra.mxu1 %v199_v2 }
   0x3   :  { %v23_v3 = vpack.c.bf16 %v22_v1, %v22_v1 }
   0x4   :  { %10 = vsyncpa [#allocation3], 0  ;;  %v197_v5 = vld [vmem:[%s302_s3 + $0x28] sm:$0xff]  ;;  %v196_v6 = vld [vmem:[%s302_s3 + $0x20] sm:$0xff]  ;;  %s229_s15 = smov [#allocation2]   ;;  %vm136_vm1 = vcmask 25600  }
   0x5   :  { %158 = vmatmul.msk.bf16.vlgmr.msra.gmra.mxu0 %vm36_vm0, %v23_v3  ;;  %v195_v7 = vld [vmem:[%s302_s3 + $0x18] sm:$0xff]  ;;  %v194_v8 = vld [vmem:[%s302_s3 + $0x10] sm:$0xff]  ;;  %v193_v9 = vld [vmem:[%s302_s3 + $0x8] sm:$0xff]  ;;  %s143_s16 = sshll.u32 %s229_s15, 4  ;;  %s144_s16 = int_to_ptr.vmem [resolvable:$true] %s143_s16 }
   0x6   :  { %124 = vmatpush.bf16.msra.mxu1 %v198_v4  ;;  %v192_v10 = vld [vmem:[%s302_s3] sm:$0xff]  ;;  %s145_s3 = sshll.u32 %s304_s5, 4  ;;  %s146_s3 = int_to_ptr.hbm [resolvable:$true] %s145_s3 }
   0x7   :  { %v201_v11 = vld [vmem:[%s301_s2] ss:$0 sm:$0xff] }
   0x8   :  { %v202_v17 = vld [vmem:[%s303_s4] ss:$0 sm:$0xff] }
   0xa   :  { %125 = vmatpush.bf16.msra.mxu1 %v197_v5 }
   0xe   :  { %126 = vmatpush.bf16.msra.mxu1 %v196_v6 }
  0x12   :  { %127 = vmatpush.bf16.msra.mxu1 %v195_v7 }
  0x16   :  { %128 = vmatpush.bf16.msra.mxu1 %v194_v8 }
  0x1a   :  { %129 = vmatpush.bf16.msra.mxu1 %v193_v9 }
  0x1e   :  { %130 = vmatpush.bf16.msra.mxu1 %v192_v10 }
  0x82   :  { %v49_v12 = vpop.f32.mrf.mxu0 }
  0x83   :  { %v50_v13 = vadd.f32 %v201_v11, %v49_v12 }
  0x85   :  { %v53_v14 = vmax.f32 %v50_v13, 0.0 }
  0x87   :  { %v54_v15 = vpack.c.bf16 %v53_v14, %v53_v14 }
  0x89   :  { %131 = vmatmul.bf16.vlgmr.msra.gmra.mxu1 %v54_v15 }
  0x8a   :  { %v51_v16 = vpop.f32.mrf.mxu0 }
 0x106   :  { %v132_v18 = vpop.f32.mrf.mxu1 }
 0x107   :  { %v133_v19 = vadd.f32 %v202_v17, %v132_v18 }
 0x109   :  { %137 = vst.msk [vmem:[#allocation2] sm:$0x3] %vm136_vm1, %v133_v19 }
 0x10a   :  { %148 = dma.vmem_to_hbm [thread:$0]  %s144_s16, 32, %s146_s3, [#allocation3]  }
 0x10e   :  { %v134_v20 = vpop.f32.mrf.mxu1 }
 0x10f   :  { %227 = dma.done.wait [#allocation3], 32  }
 0x110   :  { %228 = vsyncadd [#allocation3], 4294967264 }
 0x111   :  { %153 = vsyncpa [#allocation3], 1 }

</bundles_post_ra>
